<compile_context>
chip_gen: v6e
topology: v6e:2x2x1
jax: 0.10.0
libtpu: 0.0.40
codegen_flags: <defaults>
</compile_context>

<pallas_src>
import functools

import numpy as np
import jax
import jax.numpy as jnp
from jax.experimental import pallas as pl
from jax.experimental.pallas import tpu as pltpu

ROW_COUNT = 6
COLUMN_COUNT = 7
INPUT_DIM = ROW_COUNT * COLUMN_COUNT   # 42 (kept unpadded; full-extent K block)
OUT_PAD = 8                            # head padded 7 -> 8 output lanes
ALIGN = 16                             # batch-tile alignment (bf16 sublane tile)


def _round_up(n, m):
    return ((n + m - 1) // m) * m


def _cdiv(a, b):
    return -(-a // b)


# ------------------------------ Pallas kernel -------------------------------

def _dqn_kernel(x_ref, w1_ref, b1_ref, w2_ref, b2_ref, w3_ref, b3_ref, o_ref):
    # fc1 + relu  (bf16 matmul inputs, f32 accumulate, f32 elementwise)
    h1 = jnp.dot(x_ref[...], w1_ref[...], preferred_element_type=jnp.float32)
    h1 = jnp.maximum(h1 + b1_ref[...], 0.0)
    # fc2 + relu
    h2 = jnp.dot(h1.astype(jnp.bfloat16), w2_ref[...],
                 preferred_element_type=jnp.float32)
    h2 = jnp.maximum(h2 + b2_ref[...], 0.0)
    # head (plain fc3, or the algebraically-folded dueling head), 8 lanes
    o_ref[...] = (jnp.dot(h2.astype(jnp.bfloat16), w3_ref[...],
                          preferred_element_type=jnp.float32)
                  + b3_ref[...])


# --------------------------- one-time param prep ----------------------------

def prepare_params(params, dueling=False):
    """Hoisted out of the per-call path.  Folds the dueling value/advantage
    streams into a single linear head (in f32, exact up to f32 rounding), pads
    the head to 8 output lanes, and casts matmul operands to bf16 (biases f32).
    Call once; pass the result to dqn_forward."""
    w1 = params["w1"].astype(jnp.bfloat16)        # (42, H1)
    b1 = params["b1"].astype(jnp.float32)          # (1, H1)
    w2 = params["w2"].astype(jnp.bfloat16)        # (H1, H2)
    b2 = params["b2"].astype(jnp.float32)          # (1, H2)

    if dueling:
        # q = value + (adv - mean(adv)) is linear in the head outputs:
        #   q = h2 @ (wa @ M + wv @ 1x7) + (ba @ M + bv @ 1x7),  M = I7 - J7/7
        M = jnp.eye(COLUMN_COUNT, dtype=jnp.float32) - (1.0 / COLUMN_COUNT)
        ones_row = jnp.ones((1, COLUMN_COUNT), jnp.float32)
        w3 = (params["wa"].astype(jnp.float32) @ M
              + params["wv"].astype(jnp.float32) @ ones_row)      # (H2, 7)
        b3 = (params["ba"].astype(jnp.float32) @ M
              + params["bv"].astype(jnp.float32) @ ones_row)      # (1, 7)
    else:
        w3 = params["w3"].astype(jnp.float32)
        b3 = params["b3"].astype(jnp.float32)

    w3p = jnp.pad(w3, ((0, 0), (0, OUT_PAD - COLUMN_COUNT))).astype(jnp.bfloat16)
    b3p = jnp.pad(b3, ((0, 0), (0, OUT_PAD - COLUMN_COUNT)))       # f32 (1, 8)
    return (w1, b1, w2, b2, w3p, b3p)


# ------------------------------ tiling policy -------------------------------

def _choose_tiling(B, tb):
    """Pick (batch tile TB, padded batch Bp).  Single tile for small batches;
    for padded batches > 1024 guarantee >=2 grid steps (dual-TC v7x sharding);
    otherwise balance ~tb-sized tiles across the grid."""
    Bp = _round_up(B, ALIGN)
    tile = _round_up(min(max(tb, ALIGN), Bp), ALIGN)
    steps = _cdiv(Bp, tile)
    if Bp > 1024 and steps < 2:
        steps = 2
    TB = _round_up(_cdiv(Bp, steps), ALIGN)
    steps = _cdiv(Bp, TB)
    return TB, TB * steps


# ------------------------------ JAX wrapper ---------------------------------

@functools.partial(jax.jit, static_argnames=("tb",))
def dqn_forward(x, prepared, tb=2048):
    """x: (..., ROW_COUNT, COLUMN_COUNT) or (B, 42) -> (B, 7) float32 Q-values."""
    w1, b1, w2, b2, w3, b3 = prepared
    x2 = x.reshape(-1, INPUT_DIM).astype(jnp.float32)
    B = x2.shape[0]
    TB, Bp = _choose_tiling(B, tb)

    # Pad the batch to a whole number of tiles; cast to bf16 for the MXU.
    # Feature dim stays at 42 (block last dim == full array dim -> legal, and
    # no extra padding pass / DMA bytes).
    x_pad = jnp.pad(x2, ((0, Bp - B), (0, 0))).astype(jnp.bfloat16)

    def batch_spec(cols):
        return pl.BlockSpec((TB, cols), lambda i: (i, 0))

    def pinned_spec(a):  # grid-invariant: stays resident in VMEM across steps
        return pl.BlockSpec(a.shape, lambda i: (0, 0))

    weights = (w1, b1, w2, b2, w3, b3)
    out_padded = pl.pallas_call(
        _dqn_kernel,
        out_shape=jax.ShapeDtypeStruct((Bp, OUT_PAD), jnp.float32),
        grid=(Bp // TB,),
        in_specs=[batch_spec(INPUT_DIM)] + [pinned_spec(a) for a in weights],
        out_specs=batch_spec(OUT_PAD),
        compiler_params=pltpu.CompilerParams(
            dimension_semantics=("parallel",),
            vmem_limit_bytes=48 * 1024 * 1024,
        ),
    )(x_pad, *weights)

    # Slice is inside the same jit -> fuses (no standalone HBM copy pass).
    return out_padded[:B, :COLUMN_COUNT]


# -------------------------- deterministic params ----------------------------

def init_params(key, model_size="default", dueling=False):
    """PyTorch nn.Linear-style init: U(-1/sqrt(fan_in), 1/sqrt(fan_in))."""
    if model_size == "large":
        hidden1, hidden2 = 512, 256
    else:
        hidden1, hidden2 = 256, 128

    def linear(k, fan_in, fan_out):
        kw, kb = jax.random.split(k)
        bound = 1.0 / np.sqrt(fan_in)
        w = jax.random.uniform(kw, (fan_in, fan_out), jnp.float32, -bound, bound)
        b = jax.random.uniform(kb, (1, fan_out), jnp.float32, -bound, bound)
        return w, b

    keys = jax.random.split(key, 5)
    params = {}
    params["w1"], params["b1"] = linear(keys[0], INPUT_DIM, hidden1)
    params["w2"], params["b2"] = linear(keys[1], hidden1, hidden2)
    if dueling:
        params["wv"], params["bv"] = linear(keys[2], hidden2, 1)
        params["wa"], params["ba"] = linear(keys[3], hidden2, COLUMN_COUNT)
    else:
        params["w3"], params["b3"] = linear(keys[4], hidden2, COLUMN_COUNT)
    return params


# ------------------------------ plain-JAX ref --------------------------------

def dqn_reference(x, params, dueling=False):
    x2 = x.reshape(-1, INPUT_DIM).astype(jnp.float32)
    h1 = jax.nn.relu(x2 @ params["w1"] + params["b1"])
    h2 = jax.nn.relu(h1 @ params["w2"] + params["b2"])
    if dueling:
        value = h2 @ params["wv"] + params["bv"]
        adv = h2 @ params["wa"] + params["ba"]
        return value + (adv - adv.mean(axis=1, keepdims=True))
    return h2 @ params["w3"] + params["b3"]


# ---------------------------------- main -------------------------------------

if __name__ == "__main__":
    key = jax.random.PRNGKey(0)
    k_x, k_x2, k_p1, k_p2 = jax.random.split(key, 4)

    # bf16 matmul inputs (f32 accumulate) -> relaxed tolerance vs f32 reference.
    RTOL, ATOL = 3e-2, 3e-2

    # --- Small board-shaped batch, plain DQN head (single grid step) ---
    batch = 8
    x = jax.random.normal(k_x, (batch, ROW_COUNT, COLUMN_COUNT), jnp.float32)
    params = init_params(k_p1, model_size="default", dueling=False)
    prep = prepare_params(params, dueling=False)         # one-time prep (hoisted)
    out = jax.block_until_ready(dqn_forward(x, prep))
    ref = dqn_reference(x, params, dueling=False)
    np.testing.assert_allclose(np.asarray(out), np.asarray(ref), rtol=RTOL, atol=ATOL)

    # --- Small batch, dueling head (folded into the same plain-linear kernel) ---
    params_d = init_params(k_p2, model_size="default", dueling=True)
    prep_d = prepare_params(params_d, dueling=True)
    out_d = jax.block_until_ready(dqn_forward(x, prep_d))
    ref_d = dqn_reference(x, params_d, dueling=True)
    np.testing.assert_allclose(np.asarray(out_d), np.asarray(ref_d), rtol=RTOL, atol=ATOL)

    # --- Larger ragged batch with a small tile to exercise multi-step tiling ---
    batch_big = 300   # padded to a multiple of the chosen tile
    xb = jax.random.normal(k_x2, (batch_big, ROW_COUNT, COLUMN_COUNT), jnp.float32)
    out_b = jax.block_until_ready(dqn_forward(xb, prep, tb=128))
    ref_b = dqn_reference(xb, params, dueling=False)
    np.testing.assert_allclose(np.asarray(out_b), np.asarray(ref_b), rtol=RTOL, atol=ATOL)

    out_bd = jax.block_until_ready(dqn_forward(xb, prep_d, tb=128))
    ref_bd = dqn_reference(xb, params_d, dueling=True)
    np.testing.assert_allclose(np.asarray(out_bd), np.asarray(ref_bd), rtol=RTOL, atol=ATOL)

    print("KERNEL_OK")
</pallas_src>

<mosaic_0001>
module attributes {stable_mosaic.version = 11 : i64} {
  func.func @_dqn_kernel(%arg0: i32, %arg1: memref<16x42xbf16, #tpu.memory_space<vmem>>, %arg2: memref<42x256xbf16, #tpu.memory_space<vmem>>, %arg3: memref<1x256xf32, #tpu.memory_space<vmem>>, %arg4: memref<256x128xbf16, #tpu.memory_space<vmem>>, %arg5: memref<1x128xf32, #tpu.memory_space<vmem>>, %arg6: memref<128x8xbf16, #tpu.memory_space<vmem>>, %arg7: memref<1x8xf32, #tpu.memory_space<vmem>>, %arg8: memref<16x8xf32, #tpu.memory_space<vmem>>) attributes {dimension_semantics = [#tpu.dimension_semantics<parallel>], iteration_bounds = array<i64: 1>, scalar_prefetch = 0 : i64, scratch_operands = 0 : i64, tpu.core_type = #tpu.core_type<tc>, window_params = [{transform_indices = @transform_0, window_bounds = array<i64: 16, 42>}, {pipeline_mode = #tpu.pipeline_mode<synchronous>, transform_indices = @transform_1, window_bounds = array<i64: 42, 256>}, {pipeline_mode = #tpu.pipeline_mode<synchronous>, transform_indices = @transform_2, window_bounds = array<i64: 1, 256>}, {pipeline_mode = #tpu.pipeline_mode<synchronous>, transform_indices = @transform_3, window_bounds = array<i64: 256, 128>}, {pipeline_mode = #tpu.pipeline_mode<synchronous>, transform_indices = @transform_4, window_bounds = array<i64: 1, 128>}, {pipeline_mode = #tpu.pipeline_mode<synchronous>, transform_indices = @transform_5, window_bounds = array<i64: 128, 8>}, {pipeline_mode = #tpu.pipeline_mode<synchronous>, transform_indices = @transform_6, window_bounds = array<i64: 1, 8>}, {transform_indices = @transform_7, window_bounds = array<i64: 16, 8>}]} {
    %c0 = arith.constant 0 : index
    %c0_0 = arith.constant 0 : index
    %0 = vector.load %arg1[%c0, %c0_0] : memref<16x42xbf16, #tpu.memory_space<vmem>>, vector<16x42xbf16>
    %c0_1 = arith.constant 0 : index
    %c0_2 = arith.constant 0 : index
    %1 = vector.load %arg2[%c0_1, %c0_2] : memref<42x256xbf16, #tpu.memory_space<vmem>>, vector<42x256xbf16>
    %cst = arith.constant dense<0.000000e+00> : vector<16x256xf32>
    %2 = tpu.matmul %0, %1, %cst {dimension_numbers = #tpu.dot_dimension_numbers<[1], [0], [0], [1], [0, 0, 1, 1], [], []>} : vector<16x42xbf16>, vector<42x256xbf16>, vector<16x256xf32> -> vector<16x256xf32>
    %c0_3 = arith.constant 0 : index
    %c0_4 = arith.constant 0 : index
    %3 = vector.load %arg3[%c0_3, %c0_4] : memref<1x256xf32, #tpu.memory_space<vmem>>, vector<1x256xf32>
    %4 = vector.broadcast %3 : vector<1x256xf32> to vector<16x256xf32>
    %5 = arith.addf %2, %4 : vector<16x256xf32>
    %cst_5 = arith.constant 0.000000e+00 : f32
    %6 = vector.broadcast %cst_5 : f32 to vector<16x256xf32>
    %7 = arith.maximumf %5, %6 : vector<16x256xf32>
    %8 = arith.truncf %7 : vector<16x256xf32> to vector<16x256xbf16>
    %c0_6 = arith.constant 0 : index
    %c0_7 = arith.constant 0 : index
    %9 = vector.load %arg4[%c0_6, %c0_7] : memref<256x128xbf16, #tpu.memory_space<vmem>>, vector<256x128xbf16>
    %cst_8 = arith.constant dense<0.000000e+00> : vector<16x128xf32>
    %10 = tpu.matmul %8, %9, %cst_8 {dimension_numbers = #tpu.dot_dimension_numbers<[1], [0], [0], [1], [0, 0, 1, 1], [], []>} : vector<16x256xbf16>, vector<256x128xbf16>, vector<16x128xf32> -> vector<16x128xf32>
    %c0_9 = arith.constant 0 : index
    %c0_10 = arith.constant 0 : index
    %11 = vector.load %arg5[%c0_9, %c0_10] : memref<1x128xf32, #tpu.memory_space<vmem>>, vector<1x128xf32>
    %12 = vector.broadcast %11 : vector<1x128xf32> to vector<16x128xf32>
    %13 = arith.addf %10, %12 : vector<16x128xf32>
    %cst_11 = arith.constant 0.000000e+00 : f32
    %14 = vector.broadcast %cst_11 : f32 to vector<16x128xf32>
    %15 = arith.maximumf %13, %14 : vector<16x128xf32>
    %16 = arith.truncf %15 : vector<16x128xf32> to vector<16x128xbf16>
    %c0_12 = arith.constant 0 : index
    %c0_13 = arith.constant 0 : index
    %17 = vector.load %arg6[%c0_12, %c0_13] : memref<128x8xbf16, #tpu.memory_space<vmem>>, vector<128x8xbf16>
    %cst_14 = arith.constant dense<0.000000e+00> : vector<16x8xf32>
    %18 = tpu.matmul %16, %17, %cst_14 {dimension_numbers = #tpu.dot_dimension_numbers<[1], [0], [0], [1], [0, 0, 1, 1], [], []>} : vector<16x128xbf16>, vector<128x8xbf16>, vector<16x8xf32> -> vector<16x8xf32>
    %c0_15 = arith.constant 0 : index
    %c0_16 = arith.constant 0 : index
    %19 = vector.load %arg7[%c0_15, %c0_16] : memref<1x8xf32, #tpu.memory_space<vmem>>, vector<1x8xf32>
    %20 = vector.broadcast %19 : vector<1x8xf32> to vector<16x8xf32>
    %21 = arith.addf %18, %20 : vector<16x8xf32>
    %c0_17 = arith.constant 0 : index
    %c0_18 = arith.constant 0 : index
    %22 = vector.load %arg8[%c0_17, %c0_18] : memref<16x8xf32, #tpu.memory_space<vmem>>, vector<16x8xf32>
    tpu.vector_store %arg8[%c0_17, %c0_18], %21 {strides = array<i32>} : memref<16x8xf32, #tpu.memory_space<vmem>>, vector<16x8xf32>,
    return
  }
  func.func @transform_0(%arg0: i32) -> (i32, i32) {
    %c0_i32 = arith.constant 0 : i32
    %c0_i32_0 = arith.constant 0 : i32
    return %arg0, %c0_i32 : i32, i32
  }
  func.func @transform_1(%arg0: i32) -> (i32, i32) {
    %c0_i32 = arith.constant 0 : i32
    %c0_i32_0 = arith.constant 0 : i32
    %c0_i32_1 = arith.constant 0 : i32
    return %c0_i32, %c0_i32_0 : i32, i32
  }
  func.func @transform_2(%arg0: i32) -> (i32, i32) {
    %c0_i32 = arith.constant 0 : i32
    %c0_i32_0 = arith.constant 0 : i32
    %c0_i32_1 = arith.constant 0 : i32
    return %c0_i32, %c0_i32_0 : i32, i32
  }
  func.func @transform_3(%arg0: i32) -> (i32, i32) {
    %c0_i32 = arith.constant 0 : i32
    %c0_i32_0 = arith.constant 0 : i32
    %c0_i32_1 = arith.constant 0 : i32
    return %c0_i32, %c0_i32_0 : i32, i32
  }
  func.func @transform_4(%arg0: i32) -> (i32, i32) {
    %c0_i32 = arith.constant 0 : i32
    %c0_i32_0 = arith.constant 0 : i32
    %c0_i32_1 = arith.constant 0 : i32
    return %c0_i32, %c0_i32_0 : i32, i32
  }
  func.func @transform_5(%arg0: i32) -> (i32, i32) {
    %c0_i32 = arith.constant 0 : i32
    %c0_i32_0 = arith.constant 0 : i32
    %c0_i32_1 = arith.constant 0 : i32
    return %c0_i32, %c0_i32_0 : i32, i32
  }
  func.func @transform_6(%arg0: i32) -> (i32, i32) {
    %c0_i32 = arith.constant 0 : i32
    %c0_i32_0 = arith.constant 0 : i32
    %c0_i32_1 = arith.constant 0 : i32
    return %c0_i32, %c0_i32_0 : i32, i32
  }
  func.func @transform_7(%arg0: i32) -> (i32, i32) {
    %c0_i32 = arith.constant 0 : i32
    %c0_i32_0 = arith.constant 0 : i32
    return %arg0, %c0_i32 : i32, i32
  }
}

</mosaic_0001>

<bundles_post_ra>
// kernel: dqn_forward.1
= control target key start
LH: loop header
LB: loop body
LE: loop exit
PB: predicated region body
PF: predicated region fallthrough
CT: control target
= control target key end

     0   :  { %vm84_vm0 = vcmask 1044480   ;;  %v561_v1 = vmov 0   ;;  %vm80_vm1 = vcmask 343040   ;;  %v562_v25 = vmov 0.0   ;;  %s712_s1 = inlined_call_operand.vmem [shape: bf16[42,256], index: 1, kind: input, shape index: {}]   ;;  %s713_s3 = inlined_call_operand.vmem [shape: bf16[256,128], index: 3, kind: input, shape index: {}]   ;;  %s714_s0 = inlined_call_operand.vmem [shape: bf16[16,42], index: 0, kind: input, shape index: {}]   ;;  %s715_s5 = inlined_call_operand.vmem [shape: bf16[128,8], index: 5, kind: input, shape index: {}]   ;;  %s716_s2 = inlined_call_operand.vmem [shape: f32[1,256], index: 2, kind: input, shape index: {}]   ;;  %s717_s4 = inlined_call_operand.vmem [shape: f32[1,128], index: 4, kind: input, shape index: {}]   ;;  %s718_s6 = inlined_call_operand.vmem [shape: f32[1,8], index: 6, kind: input, shape index: {}]   ;;  %s719_s7 = inlined_call_operand.vmem [shape: f32[16,8], index: 7, kind: output, shape index: {}]  }
   0x1   :  { %v527_v0 = vld [vmem:[%s712_s1 + $0x24] ss:$8 sps:$4 sm:$0x1f]   ;;  %123 = vmatprep.mubr.bf16.mxu0 %v561_v1  ;;  %v529_v2 = vld [vmem:[%s712_s1 + $0x20] ss:$8 sps:$4 sm:$0x1f]   ;;  %v37_v30 = vlaneseq }
   0x2   :  { %445 = vmatprep.subr.msk.bf16.mxu0 %vm84_vm0, %v527_v0  ;;  %v530_v3 = vld [vmem:[%s712_s1 + $0x14] ss:$8 sps:$4 sm:$0xff]   ;;  %v86_v4 = vsel %vm84_vm0, %v529_v2, 0  ;;  %v532_v5 = vld [vmem:[%s712_s1 + $0x10] ss:$8 sps:$4 sm:$0xff]   ;;  %v541_v12 = vld [vmem:[%s713_s3 + $0x68] sm:$0xff]  }
   0x3   :  { %102 = vmatpush1.bf16.msra.mxu0 %v86_v4  ;;  %v533_v6 = vld [vmem:[%s712_s1 + $0x4] ss:$8 sps:$4 sm:$0xff]   ;;  %v537_v7 = vld [vmem:[%s713_s3 + $0x78] sm:$0xff]   ;;  %v535_v8 = vld [vmem:[%s712_s1] ss:$8 sps:$4 sm:$0xff]   ;;  %v38_v31 = vshrl.u32 %v37_v30, 7 }
   0x4   :  { %103 = vmatprep.subr.bf16.mxu0 %v530_v3  ;;  %v538_v9 = vld [vmem:[%s713_s3 + $0x38] sm:$0xff]   ;;  %473 = vmatprep.subr.bf16.mxu1 %v537_v7  ;;  %v539_v10 = vld [vmem:[%s713_s3 + $0x70] sm:$0xff]   ;;  %v536_v13 = vld [vmem:[%s714_s0] sm:$0xff]   ;;  %vm563_vm2 = vmmov 0   ;;  %vm431_vm3 = vcmask 64512  }
   0x5   :  { %474 = vmatpush3.bf16.msra.mxu1 %v538_v9  ;;  %v540_v11 = vld [vmem:[%s713_s3 + $0x30] sm:$0xff]   ;;  %v542_v14 = vld [vmem:[%s713_s3 + $0x28] sm:$0xff]   ;;  %v543_v15 = vld [vmem:[%s713_s3 + $0x60] sm:$0xff]   ;;  %v43_v32 = vsub.s32 1, %v38_v31  ;;  %v39_v33 = vsub.s32 0, %v38_v31 }
   0x6   :  { %475 = vmatprep.subr.bf16.mxu1 %v539_v10  ;;  %v544_v16 = vld [vmem:[%s713_s3 + $0x20] sm:$0xff]   ;;  %v545_v17 = vld [vmem:[%s713_s3 + $0x58] sm:$0xff]   ;;  %v547_v19 = vld [vmem:[%s713_s3 + $0x50] sm:$0xff]  }
   0x7   :  { %104 = vmatpush1.bf16.msra.mxu0 %v532_v5  ;;  %v546_v18 = vld [vmem:[%s713_s3 + $0x18] sm:$0xff]   ;;  %v548_v20 = vld [vmem:[%s713_s3 + $0x10] sm:$0xff]   ;;  %v549_v21 = vld [vmem:[%s713_s3 + $0x48] sm:$0xff]  }
   0x8   :  { %105 = vmatprep.subr.bf16.mxu0 %v533_v6  ;;  %v550_v22 = vld [vmem:[%s713_s3 + $0x8] sm:$0xff]   ;;  %v551_v23 = vld [vmem:[%s713_s3 + $0x40] sm:$0xff]   ;;  %v553_v26 = vld [vmem:[%s715_s5 + $0x38] sm:$0xff]  }
   0x9   :  { %476 = vmatpush3.bf16.msra.mxu1 %v540_v11  ;;  %v552_v24 = vld [vmem:[%s713_s3] sm:$0xff]   ;;  %v554_v27 = vld [vmem:[%s715_s5 + $0x30] sm:$0xff]   ;;  %v555_v28 = vld [vmem:[%s715_s5 + $0x28] sm:$0xff]  }
   0xa   :  { %477 = vmatprep.subr.bf16.mxu1 %v541_v12  ;;  %v556_v29 = vld [vmem:[%s715_s5 + $0x20] sm:$0xff]   ;;  %v557_v51 = vld [vmem:[%s715_s5 + $0x18] sm:$0xff]   ;;  %v558_v52 = vld [vmem:[%s715_s5 + $0x10] sm:$0xff]  }
   0xb   :  { %106 = vmatpush1.bf16.msra.mxu0 %v535_v8  ;;  %v35_v34 = vld [vmem:[%s716_s2] sm:$0x3]  ;;  %v559_v53 = vld [vmem:[%s715_s5 + $0x8] sm:$0xff]  }
   0xc   :  { %504 = vmatprep.subr.bf16.mxu0 %v562_v25  ;;  %v44_v36 = vrot.slane %v35_v34, %v43_v32  ;;  %v40_v37 = vrot.slane %v35_v34, %v39_v33  ;;  %v560_v54 = vld [vmem:[%s715_s5] sm:$0xff]  }
   0xd   :  { %478 = vmatpush3.bf16.msra.mxu1 %v542_v14  ;;  %v447_v58 = vld [vmem:[%s717_s4] ss:$0 sm:$0xff] }
   0xe   :  { %446 = vmatmul.mubr.msk.bf16.vlgmr.msra.gmra.mxu0 %vm80_vm1, %v536_v13  ;;  %479 = vmatprep.subr.bf16.mxu1 %v543_v15  ;;  %v464_v3 = vld [vmem:[%s718_s6] ss:$0 sm:$0xff] }
   0xf   :  { %505 = vmatpush3.bf16.msra.mxu0 %v553_v26  ;;  %520 = vmatprep.mubr.msk.bf16.mxu0 %vm563_vm2, %v562_v25 }
  0x10   :  { %506 = vmatprep.subr.bf16.mxu0 %v562_v25 }
  0x11   :  { %480 = vmatpush3.bf16.msra.mxu1 %v544_v16 }
  0x12   :  { %481 = vmatprep.subr.bf16.mxu1 %v545_v17 }
  0x13   :  { %507 = vmatpush3.bf16.msra.mxu0 %v554_v27 }
  0x14   :  { %508 = vmatprep.subr.bf16.mxu0 %v562_v25 }
  0x15   :  { %482 = vmatpush3.bf16.msra.mxu1 %v546_v18 }
  0x16   :  { %483 = vmatprep.subr.bf16.mxu1 %v547_v19 }
  0x17   :  { %509 = vmatpush3.bf16.msra.mxu0 %v555_v28 }
  0x18   :  { %510 = vmatprep.subr.bf16.mxu0 %v562_v25 }
  0x19   :  { %484 = vmatpush3.bf16.msra.mxu1 %v548_v20 }
  0x1a   :  { %485 = vmatprep.subr.bf16.mxu1 %v549_v21 }
  0x1b   :  { %511 = vmatpush3.bf16.msra.mxu0 %v556_v29 }
  0x1c   :  { %512 = vmatprep.subr.bf16.mxu0 %v562_v25 }
  0x1d   :  { %486 = vmatpush3.bf16.msra.mxu1 %v550_v22 }
  0x1e   :  { %487 = vmatprep.subr.bf16.mxu1 %v551_v23 }
  0x1f   :  { %513 = vmatpush3.bf16.msra.mxu0 %v557_v51 }
  0x20   :  { %514 = vmatprep.subr.bf16.mxu0 %v562_v25 }
  0x21   :  { %488 = vmatpush3.bf16.msra.mxu1 %v552_v24 }
  0x23   :  { %515 = vmatpush3.bf16.msra.mxu0 %v558_v52 }
  0x24   :  { %516 = vmatprep.subr.bf16.mxu0 %v562_v25 }
  0x27   :  { %517 = vmatpush3.bf16.msra.mxu0 %v559_v53 }
  0x28   :  { %518 = vmatprep.subr.bf16.mxu0 %v562_v25 }
  0x2b   :  { %519 = vmatpush3.bf16.msra.mxu0 %v560_v54 }
  0xce   :  { %v125_v35 = vpop.f32.mrf.mxu0 }
  0xcf   :  { %v126_v42 = vadd.f32 %v125_v35, %v40_v37 }
  0xd0   :  { %v127_v38 = vpop.f32.mrf.mxu0 }
  0xd1   :  { %v128_v40 = vadd.f32 %v127_v38, %v44_v36  ;;  %v134_v48 = vmax.f32 %v126_v42, 0.0 }
  0xd2   :  { %v129_v39 = vpop.f32.mrf.mxu0 }
  0xd3   :  { %v130_v41 = vadd.f32 %v129_v39, %v40_v37  ;;  %v135_v46 = vmax.f32 %v128_v40, 0.0 }
  0xd4   :  { %v131_v43 = vpop.f32.mrf.mxu0 }
  0xd5   :  { %v132_v44 = vadd.f32 %v131_v43, %v44_v36  ;;  %v136_v45 = vmax.f32 %v130_v41, 0.0 }
  0xd7   :  { %v137_v47 = vmax.f32 %v132_v44, 0.0  ;;  %v138_v50 = vpack.c.bf16 %v136_v45, %v134_v48 }
  0xd9   :  { %v139_v49 = vpack.c.bf16 %v137_v47, %v135_v46 }
  0xdb   :  { %307 = vmatprep.mubr.bf16.mxu1 %v139_v49 }
  0xdc   :  { %308 = vmatmul.mubr.bf16.vlgmr.msra.gmra.mxu1 %v138_v50 }
 0x19c   :  { %v489_v55 = vpop.f32.mrf.mxu1 }
 0x19e   :  { %v490_v56 = vpop.f32.mrf.mxu1 }
 0x19f   :  { %v491_v57 = vadd.f32 %v490_v56, %v489_v55 }
 0x1a0   :  { %v492_v59 = vpop.f32.mrf.mxu1 }
 0x1a1   :  { %v310_v61 = vadd.f32 %v491_v57, %v447_v58 }
 0x1a2   :  { %v493_v60 = vpop.f32.mrf.mxu1 }
 0x1a3   :  { %v494_v62 = vadd.f32 %v493_v60, %v492_v59  ;;  %v316_v0 = vmax.f32 %v310_v61, 0.0 }
 0x1a5   :  { %v313_v63 = vadd.f32 %v494_v62, %v447_v58 }
 0x1a7   :  { %v317_v1 = vmax.f32 %v313_v63, 0.0 }
 0x1a9   :  { %v318_v2 = vpack.c.bf16 %v317_v1, %v316_v0 }
 0x1ab   :  { %521 = vmatmul.mubr.bf16.vlgmr.msra.gmra.mxu0 %v318_v2 }
 0x26b   :  { %v424_v4 = vpop.f32.mrf.mxu0 }
 0x26c   :  { %v425_v5 = vadd.f32 %v464_v3, %v424_v4 }
 0x26d   :  { %v522_v6 = vpop.f32.mrf.mxu0 }
 0x26e   :  { %432 = vst.msk [vmem:[%s719_s7] sm:$0xff] %vm431_vm3, %v425_v5 }
 0x26f   :  { %v427_v7 = vpop.f32.mrf.mxu0 }
 0x270   :  { %v428_v8 = vadd.f32 %v464_v3, %v427_v7 }
 0x271   :  { %v523_v9 = vpop.f32.mrf.mxu0 }
 0x272   :  { %433 = vst.msk [vmem:[%s719_s7 + $0x8] sm:$0xff] %vm431_vm3, %v428_v8 }

</bundles_post_ra>
